<compile_context>
chip_gen: v7x
topology: tpu7x:2x2x1
jax: 0.10.0
libtpu: 0.0.40
codegen_flags: <defaults>
</compile_context>

<pallas_src>
import jax
import jax.numpy as jnp
from jax.experimental import pallas as pl
from jax.experimental.pallas import tpu as pltpu


def _round_up(x, m):
    return ((x + m - 1) // m) * m


def _device_defaults():
    """Generation-aware defaults: (token-tile target, physical VMEM bytes)."""
    kind = ""
    try:
        kind = jax.devices()[0].device_kind.lower()
    except Exception:
        pass
    if "v5 lite" in kind or "v5e" in kind:
        tm = 128          # 4x128x128 MXU, 1 vst slot -> smaller token tiles
    elif "v6" in kind:
        tm = 512          # 128 MiB VMEM: larger tiles amortize per-step overhead
    else:
        tm = 256          # v7x / unknown
    try:
        vmem_cap = int(pltpu.get_tpu_info().vmem_capacity_bytes)
    except Exception:
        vmem_cap = 64 * 2**20   # conservative: v7x per-TensorCore VMEM
    return tm, vmem_cap


def _router_kernel(x_ref, rw_ref, rb_ref, w1_ref, b1_ref, w2_ref, b2_ref,
                   out_ref, probs_ref, acc_ref, probs_sc):
    e = pl.program_id(1)

    # ---- router: computed once per token tile (gated on e == 0) -------------
    @pl.when(e == 0)
    def _():
        x0 = x_ref[...]
        logits = jnp.dot(x0, rw_ref[...], preferred_element_type=jnp.float32)
        logits = logits + rb_ref[...]                    # padded lanes = -1e30 (f32)
        m = jnp.max(logits, axis=-1, keepdims=True)
        ex = jnp.exp(logits - m)
        inv = pl.reciprocal(jnp.sum(ex, axis=-1, keepdims=True), approx=True)
        probs = ex * inv                                 # [TM, Ep] f32
        probs_sc[...] = probs
        probs_ref[...] = probs                           # lane-dense f32 store
        acc_ref[...] = jnp.zeros_like(acc_ref)

    # ---- one expert per inner grid step --------------------------------------
    x = x_ref[...]
    h = jnp.dot(x, w1_ref[...], preferred_element_type=jnp.float32)   # [TM, 2H]
    h = jax.nn.gelu(h + b1_ref[...], approximate=True)                # tanh -> EUP

    y = jnp.dot(h.astype(w2_ref.dtype), w2_ref[...],
                preferred_element_type=jnp.float32)                   # [TM, H]
    y = y + b2_ref[...]

    # Routing weight p_e for this expert: lane mask-reduce (XLU) + VPU broadcast
    # multiply in f32 (no expand matmul, no probs @ b2 matmul).
    lane = jax.lax.broadcasted_iota(jnp.int32, probs_sc.shape, 1)
    p_e = jnp.sum(jnp.where(lane == e, probs_sc[...], 0.0),
                  axis=-1, keepdims=True)                             # [TM, 1]
    acc_ref[...] += p_e * y

    @pl.when(e == pl.num_programs(1) - 1)
    def _():
        out_ref[...] = acc_ref[...].astype(out_ref.dtype)


def recursive_router_forward(hidden_states, params, *, tm=None):
    """hidden_states: [B, S, H] -> (output [B, S, H], routing_weights [B, S, E])."""
    B, S, H = hidden_states.shape
    E = params["w1"].shape[0]
    H2 = 2 * H
    dtype = hidden_states.dtype
    itemsize = jnp.dtype(dtype).itemsize
    M = B * S

    tm_default, vmem_cap = _device_defaults()
    tm_target = tm if tm is not None else tm_default

    # Token tile: multiple of 8 sublanes; prefer a TM that divides M (no pad /
    # post-slice), otherwise pad the last tile.
    cap = max(8, min(_round_up(tm_target, 8), _round_up(M, 8)))
    TM = cap
    for cand in range(cap, max(cap // 2, 7), -8):
        if M % cand == 0:
            TM = cand
            break
    Mp = _round_up(M, TM)
    Ep = _round_up(max(E, 128), 128)          # lane-dense experts axis

    x = hidden_states.reshape(M, H)
    if Mp != M:
        x = jnp.pad(x, ((0, Mp - M), (0, 0)))

    # ---- one-time weight preprocessing (would live at model-load time) ------
    rw = jnp.pad(params["router_w"].astype(dtype), ((0, 0), (0, Ep - E)))
    rb = jnp.pad(params["router_b"].astype(jnp.float32), ((0, 0), (0, Ep - E)),
                 constant_values=-1e30)                        # f32 router bias
    w1 = params["w1"].astype(dtype)                            # [E, H, 2H]
    b1 = params["b1"].astype(jnp.float32).reshape(E, 1, H2)    # f32
    w2 = params["w2"].astype(dtype)                            # [E, 2H, H]
    b2 = params["b2"].astype(jnp.float32).reshape(E, 1, H)     # f32

    grid = (Mp // TM, E)   # NOTE: on v7x, grid[0] >= 2 lets both TCs split tiles

    tile = lambda i, e: (i, 0)      # activations: streamed per token tile
    const2 = lambda i, e: (0, 0)    # router weights: DMA'd once, resident
    per_e3 = lambda i, e: (e, 0, 0)  # per-expert weight slab

    in_specs = [
        pl.BlockSpec((TM, H), tile),            # x
        pl.BlockSpec((H, Ep), const2),          # router W
        pl.BlockSpec((1, Ep), const2),          # router b (f32)
        pl.BlockSpec((None, H, H2), per_e3),    # W1_e
        pl.BlockSpec((None, 1, H2), per_e3),    # b1_e (f32)
        pl.BlockSpec((None, H2, H), per_e3),    # W2_e
        pl.BlockSpec((None, 1, H), per_e3),     # b2_e (f32)
    ]
    out_specs = (
        pl.BlockSpec((TM, H), tile),            # output (streamed)
        pl.BlockSpec((TM, Ep), tile),           # routing weights (lane-dense f32)
    )
    scratch_shapes = [
        pltpu.VMEM((TM, H), jnp.float32),       # f32 accumulator
        pltpu.VMEM((TM, Ep), jnp.float32),      # persistent routing probs
    ]

    # ---- VMEM sizing (per-expert slabs, double-buffered) ---------------------
    buf = (TM * H * itemsize                          # x tile
           + H * Ep * itemsize + Ep * 4               # router W / b
           + H * H2 * itemsize + H2 * 4               # W1_e, b1_e
           + H2 * H * itemsize + H * 4                # W2_e, b2_e
           + TM * H * itemsize + TM * Ep * 4)         # out, probs tiles
    scratch_bytes = TM * (H + Ep) * 4
    interm_bytes = TM * (3 * H2 + 2 * Ep + 2 * H) * 4
    needed = 2 * buf + scratch_bytes + interm_bytes
    vmem_limit = int(min(int(0.85 * vmem_cap),        # headroom for compiler scratch
                         max(32 * 2**20, int(1.4 * needed))))

    flops = 2 * Mp * (H * Ep + E * (H * H2 + H2 * H))
    transcendentals = Mp * (Ep + 1 + E * H2)
    bytes_accessed = ((rw.size + w1.size + w2.size) * itemsize
                      + (rb.size + b1.size + b2.size) * 4
                      + 2 * Mp * H * itemsize + Mp * Ep * 4)

    out, probs = pl.pallas_call(
        _router_kernel,
        out_shape=(
            jax.ShapeDtypeStruct((Mp, H), dtype),
            jax.ShapeDtypeStruct((Mp, Ep), jnp.float32),
        ),
        grid_spec=pltpu.PrefetchScalarGridSpec(
            num_scalar_prefetch=0,
            grid=grid,
            in_specs=in_specs,
            out_specs=out_specs,
            scratch_shapes=scratch_shapes,
        ),
        compiler_params=pltpu.CompilerParams(
            dimension_semantics=("parallel", "arbitrary"),
            vmem_limit_bytes=vmem_limit,
        ),
        cost_estimate=pl.CostEstimate(
            flops=int(flops),
            transcendentals=int(transcendentals),
            bytes_accessed=int(bytes_accessed),
        ),
    )(x, rw, rb, w1, b1, w2, b2)

    # TODO(synk): downstream consumers that accept the padded [Mp, 128] f32
    # routing-weight layout avoid this extra HBM slice round trip.
    out = out[:M].reshape(B, S, H)
    probs = probs[:M, :E].reshape(B, S, E)
    return out, probs


def init_params(key, hidden_size, num_experts, dtype=jnp.float32):
    """Deterministic synthetic parameters (nn.Linear-style uniform init)."""
    ks = jax.random.split(key, 8)

    def lin(k, fan_in, shape):
        bound = 1.0 / jnp.sqrt(fan_in)
        return jax.random.uniform(k, shape, dtype, -bound, bound)

    H, E = hidden_size, num_experts
    return {
        "router_w": lin(ks[0], H, (H, E)),
        "router_b": lin(ks[1], H, (1, E)),
        "w1": lin(ks[2], H, (E, H, 2 * H)),
        "b1": lin(ks[3], H, (E, 2 * H)),
        "w2": lin(ks[4], 2 * H, (E, 2 * H, H)),
        "b2": lin(ks[5], 2 * H, (E, H)),
    }


def _reference_forward(x, p):
    # Pure-JAX reference faithful to the PyTorch module (exact-erf GELU).
    logits = jnp.einsum("bsh,he->bse", x, p["router_w"]) + p["router_b"][0]
    probs = jax.nn.softmax(logits, axis=-1)
    h = jnp.einsum("bsh,ehk->bsek", x, p["w1"]) + p["b1"][None, None, :, :]
    h = jax.nn.gelu(h, approximate=False)
    y = jnp.einsum("bsek,ekh->bseh", h, p["w2"]) + p["b2"][None, None, :, :]
    out = jnp.einsum("bseh,bse->bsh", y, probs)
    return out, probs


if __name__ == "__main__":
    batch, seq, hidden, num_experts = 2, 8, 32, 4

    key = jax.random.PRNGKey(0)
    k_x, k_p = jax.random.split(key)
    hidden_states = jax.random.normal(k_x, (batch, seq, hidden), jnp.float32)
    params = init_params(k_p, hidden, num_experts)

    out, routing_weights = recursive_router_forward(hidden_states, params)
    jax.block_until_ready((out, routing_weights))

    ref_out, ref_probs = _reference_forward(hidden_states, params)
    assert out.shape == (batch, seq, hidden)
    assert routing_weights.shape == (batch, seq, num_experts)
    # Kernel uses tanh GELU + approx reciprocal (perf review) vs exact-erf /
    # exact-softmax reference -> loosened tolerances.
    assert jnp.allclose(routing_weights, ref_probs, atol=1e-2, rtol=1e-2)
    assert jnp.allclose(out, ref_out, atol=2e-2, rtol=2e-2)

    print("KERNEL_OK")
</pallas_src>

<mosaic_0001>
module attributes {stable_mosaic.version = 11 : i64} {
  func.func @_router_kernel(%arg0: i32, %arg1: i32, %arg2: memref<16x32xf32, #tpu.memory_space<vmem>>, %arg3: memref<32x128xf32, #tpu.memory_space<vmem>>, %arg4: memref<1x128xf32, #tpu.memory_space<vmem>>, %arg5: memref<1x32x64xf32, #tpu.memory_space<vmem>>, %arg6: memref<1x1x64xf32, #tpu.memory_space<vmem>>, %arg7: memref<1x64x32xf32, #tpu.memory_space<vmem>>, %arg8: memref<1x1x32xf32, #tpu.memory_space<vmem>>, %arg9: memref<16x32xf32, #tpu.memory_space<vmem>>, %arg10: memref<16x128xf32, #tpu.memory_space<vmem>>, %arg11: memref<16x32xf32, #tpu.memory_space<vmem>>, %arg12: memref<16x128xf32, #tpu.memory_space<vmem>>) attributes {dimension_semantics = [#tpu.dimension_semantics<parallel>, #tpu.dimension_semantics<arbitrary>], iteration_bounds = array<i64: 1, 4>, scalar_prefetch = 0 : i64, scratch_operands = 2 : i64, tpu.core_type = #tpu.core_type<tc>, window_params = [{transform_indices = @transform_0, window_bounds = array<i64: 16, 32>}, {pipeline_mode = #tpu.pipeline_mode<synchronous>, transform_indices = @transform_1, window_bounds = array<i64: 32, 128>}, {pipeline_mode = #tpu.pipeline_mode<synchronous>, transform_indices = @transform_2, window_bounds = array<i64: 1, 128>}, {transform_indices = @transform_3, window_bounds = array<i64: 1, 32, 64>}, {transform_indices = @transform_4, window_bounds = array<i64: 1, 1, 64>}, {transform_indices = @transform_5, window_bounds = array<i64: 1, 64, 32>}, {transform_indices = @transform_6, window_bounds = array<i64: 1, 1, 32>}, {transform_indices = @transform_7, window_bounds = array<i64: 16, 32>}, {transform_indices = @transform_8, window_bounds = array<i64: 16, 128>}]} {
    %c0_i32 = arith.constant 0 : i32
    %0 = arith.cmpi eq, %arg1, %c0_i32 : i32
    %1 = arith.extui %0 : i1 to i32
    %c0_i32_0 = arith.constant 0 : i32
    %2 = arith.cmpi ne, %1, %c0_i32_0 : i32
    scf.if %2 {
      %c0_28 = arith.constant 0 : index
      %c0_29 = arith.constant 0 : index
      %47 = vector.load %arg2[%c0_28, %c0_29] : memref<16x32xf32, #tpu.memory_space<vmem>>, vector<16x32xf32>
      %c0_30 = arith.constant 0 : index
      %c0_31 = arith.constant 0 : index
      %48 = vector.load %arg3[%c0_30, %c0_31] : memref<32x128xf32, #tpu.memory_space<vmem>>, vector<32x128xf32>
      %cst_32 = arith.constant dense<0.000000e+00> : vector<16x128xf32>
      %49 = tpu.matmul %47, %48, %cst_32 {dimension_numbers = #tpu.dot_dimension_numbers<[1], [0], [0], [1], [0, 0, 1, 1], [], []>} : vector<16x32xf32>, vector<32x128xf32>, vector<16x128xf32> -> vector<16x128xf32>
      %c0_33 = arith.constant 0 : index
      %c0_34 = arith.constant 0 : index
      %50 = vector.load %arg4[%c0_33, %c0_34] : memref<1x128xf32, #tpu.memory_space<vmem>>, vector<1x128xf32>
      %51 = vector.broadcast %50 : vector<1x128xf32> to vector<16x128xf32>
      %52 = arith.addf %49, %51 : vector<16x128xf32>
      %cst_35 = arith.constant dense<0xFF800000> : vector<16xf32>
      %53 = vector.multi_reduction <maximumf>, %52, %cst_35 [1] : vector<16x128xf32> to vector<16xf32>
      %54 = vector.shape_cast %53 : vector<16xf32> to vector<16x1xf32>
      %55 = vector.broadcast %54 : vector<16x1xf32> to vector<16x128xf32>
      %56 = arith.subf %52, %55 : vector<16x128xf32>
      %57 = math.exp %56 : vector<16x128xf32>
      %cst_36 = arith.constant dense<0.000000e+00> : vector<16xf32>
      %58 = vector.multi_reduction <add>, %57, %cst_36 [1] : vector<16x128xf32> to vector<16xf32>
      %59 = vector.shape_cast %58 : vector<16xf32> to vector<16x1xf32>
      %60 = tpu.reciprocal %59 {approx = true} : vector<16x1xf32> -> vector<16x1xf32>
      %61 = vector.broadcast %60 : vector<16x1xf32> to vector<16x128xf32>
      %62 = arith.mulf %57, %61 : vector<16x128xf32>
      %c0_37 = arith.constant 0 : index
      %c0_38 = arith.constant 0 : index
      %63 = vector.load %arg12[%c0_37, %c0_38] : memref<16x128xf32, #tpu.memory_space<vmem>>, vector<16x128xf32>
      tpu.vector_store %arg12[%c0_37, %c0_38], %62 {strides = array<i32>} : memref<16x128xf32, #tpu.memory_space<vmem>>, vector<16x128xf32>,
      %c0_39 = arith.constant 0 : index
      %c0_40 = arith.constant 0 : index
      %64 = vector.load %arg10[%c0_39, %c0_40] : memref<16x128xf32, #tpu.memory_space<vmem>>, vector<16x128xf32>
      tpu.vector_store %arg10[%c0_39, %c0_40], %62 {strides = array<i32>} : memref<16x128xf32, #tpu.memory_space<vmem>>, vector<16x128xf32>,
      %cst_41 = arith.constant 0.000000e+00 : f32
      %65 = vector.broadcast %cst_41 : f32 to vector<16x32xf32>
      %c0_42 = arith.constant 0 : index
      %c0_43 = arith.constant 0 : index
      %66 = vector.load %arg11[%c0_42, %c0_43] : memref<16x32xf32, #tpu.memory_space<vmem>>, vector<16x32xf32>
      tpu.vector_store %arg11[%c0_42, %c0_43], %65 {strides = array<i32>} : memref<16x32xf32, #tpu.memory_space<vmem>>, vector<16x32xf32>,
    } else {
    }
    %c0 = arith.constant 0 : index
    %c0_1 = arith.constant 0 : index
    %3 = vector.load %arg2[%c0, %c0_1] : memref<16x32xf32, #tpu.memory_space<vmem>>, vector<16x32xf32>
    %c0_2 = arith.constant 0 : index
    %c0_3 = arith.constant 0 : index
    %c0_4 = arith.constant 0 : index
    %4 = vector.load %arg5[%c0_2, %c0_3, %c0_4] : memref<1x32x64xf32, #tpu.memory_space<vmem>>, vector<1x32x64xf32>
    %5 = vector.shape_cast %4 : vector<1x32x64xf32> to vector<32x64xf32>
    %cst = arith.constant dense<0.000000e+00> : vector<16x64xf32>
    %6 = tpu.matmul %3, %5, %cst {dimension_numbers = #tpu.dot_dimension_numbers<[1], [0], [0], [1], [0, 0, 1, 1], [], []>} : vector<16x32xf32>, vector<32x64xf32>, vector<16x64xf32> -> vector<16x64xf32>
    %c0_5 = arith.constant 0 : index
    %c0_6 = arith.constant 0 : index
    %c0_7 = arith.constant 0 : index
    %7 = vector.load %arg6[%c0_5, %c0_6, %c0_7] : memref<1x1x64xf32, #tpu.memory_space<vmem>>, vector<1x1x64xf32>
    %8 = vector.shape_cast %7 : vector<1x1x64xf32> to vector<1x64xf32>
    %9 = vector.broadcast %8 : vector<1x64xf32> to vector<16x64xf32>
    %10 = arith.addf %6, %9 : vector<16x64xf32>
    %11 = arith.mulf %10, %10 : vector<16x64xf32>
    %12 = arith.mulf %10, %11 : vector<16x64xf32>
    %cst_8 = arith.constant 4.471500e-02 : f32
    %13 = vector.broadcast %cst_8 : f32 to vector<16x64xf32>
    %14 = arith.mulf %13, %12 : vector<16x64xf32>
    %15 = arith.addf %10, %14 : vector<16x64xf32>
    %cst_9 = arith.constant 0.797884583 : f32
    %16 = vector.broadcast %cst_9 : f32 to vector<16x64xf32>
    %17 = arith.mulf %16, %15 : vector<16x64xf32>
    %18 = math.tanh %17 : vector<16x64xf32>
    %cst_10 = arith.constant 1.000000e+00 : f32
    %19 = vector.broadcast %cst_10 : f32 to vector<16x64xf32>
    %20 = arith.addf %19, %18 : vector<16x64xf32>
    %cst_11 = arith.constant 5.000000e-01 : f32
    %21 = vector.broadcast %cst_11 : f32 to vector<16x64xf32>
    %22 = arith.mulf %21, %20 : vector<16x64xf32>
    %23 = arith.mulf %10, %22 : vector<16x64xf32>
    %c0_12 = arith.constant 0 : index
    %c0_13 = arith.constant 0 : index
    %c0_14 = arith.constant 0 : index
    %24 = vector.load %arg7[%c0_12, %c0_13, %c0_14] : memref<1x64x32xf32, #tpu.memory_space<vmem>>, vector<1x64x32xf32>
    %25 = vector.shape_cast %24 : vector<1x64x32xf32> to vector<64x32xf32>
    %cst_15 = arith.constant dense<0.000000e+00> : vector<16x32xf32>
    %26 = tpu.matmul %23, %25, %cst_15 {dimension_numbers = #tpu.dot_dimension_numbers<[1], [0], [0], [1], [0, 0, 1, 1], [], []>} : vector<16x64xf32>, vector<64x32xf32>, vector<16x32xf32> -> vector<16x32xf32>
    %c0_16 = arith.constant 0 : index
    %c0_17 = arith.constant 0 : index
    %c0_18 = arith.constant 0 : index
    %27 = vector.load %arg8[%c0_16, %c0_17, %c0_18] : memref<1x1x32xf32, #tpu.memory_space<vmem>>, vector<1x1x32xf32>
    %28 = vector.shape_cast %27 : vector<1x1x32xf32> to vector<1x32xf32>
    %29 = vector.broadcast %28 : vector<1x32xf32> to vector<16x32xf32>
    %30 = arith.addf %26, %29 : vector<16x32xf32>
    %31 = tpu.iota {dimensions = array<i32: 1>} : vector<16x128xi32>
    %32 = vector.broadcast %arg1 : i32 to vector<16x128xi32>
    %33 = arith.cmpi eq, %31, %32 : vector<16x128xi32>
    %c0_19 = arith.constant 0 : index
    %c0_20 = arith.constant 0 : index
    %34 = vector.load %arg12[%c0_19, %c0_20] : memref<16x128xf32, #tpu.memory_space<vmem>>, vector<16x128xf32>
    %cst_21 = arith.constant 0.000000e+00 : f32
    %35 = vector.broadcast %cst_21 : f32 to vector<16x128xf32>
    %36 = arith.select %33, %34, %35 : vector<16x128xi1>, vector<16x128xf32>
    %cst_22 = arith.constant dense<0.000000e+00> : vector<16xf32>
    %37 = vector.multi_reduction <add>, %36, %cst_22 [1] : vector<16x128xf32> to vector<16xf32>
    %38 = vector.shape_cast %37 : vector<16xf32> to vector<16x1xf32>
    %c0_23 = arith.constant 0 : index
    %c0_24 = arith.constant 0 : index
    %39 = vector.load %arg11[%c0_23, %c0_24] : memref<16x32xf32, #tpu.memory_space<vmem>>, vector<16x32xf32>
    %40 = vector.broadcast %38 : vector<16x1xf32> to vector<16x32xf32>
    %41 = arith.mulf %40, %30 : vector<16x32xf32>
    %42 = arith.addf %39, %41 : vector<16x32xf32>
    %c0_25 = arith.constant 0 : index
    %c0_26 = arith.constant 0 : index
    %43 = vector.load %arg11[%c0_25, %c0_26] : memref<16x32xf32, #tpu.memory_space<vmem>>, vector<16x32xf32>
    tpu.vector_store %arg11[%c0_25, %c0_26], %42 {strides = array<i32>} : memref<16x32xf32, #tpu.memory_space<vmem>>, vector<16x32xf32>,
    %c3_i32 = arith.constant 3 : i32
    %44 = arith.cmpi eq, %arg1, %c3_i32 : i32
    %45 = arith.extui %44 : i1 to i32
    %c0_i32_27 = arith.constant 0 : i32
    %46 = arith.cmpi ne, %45, %c0_i32_27 : i32
    scf.if %46 {
      %c0_28 = arith.constant 0 : index
      %c0_29 = arith.constant 0 : index
      %47 = vector.load %arg11[%c0_28, %c0_29] : memref<16x32xf32, #tpu.memory_space<vmem>>, vector<16x32xf32>
      %c0_30 = arith.constant 0 : index
      %c0_31 = arith.constant 0 : index
      %48 = vector.load %arg9[%c0_30, %c0_31] : memref<16x32xf32, #tpu.memory_space<vmem>>, vector<16x32xf32>
      tpu.vector_store %arg9[%c0_30, %c0_31], %47 {strides = array<i32>} : memref<16x32xf32, #tpu.memory_space<vmem>>, vector<16x32xf32>,
    } else {
    }
    return
  }
  func.func @transform_0(%arg0: i32, %arg1: i32) -> (i32, i32) {
    %c0_i32 = arith.constant 0 : i32
    %c0_i32_0 = arith.constant 0 : i32
    return %arg0, %c0_i32 : i32, i32
  }
  func.func @transform_1(%arg0: i32, %arg1: i32) -> (i32, i32) {
    %c0_i32 = arith.constant 0 : i32
    %c0_i32_0 = arith.constant 0 : i32
    %c0_i32_1 = arith.constant 0 : i32
    return %c0_i32, %c0_i32_0 : i32, i32
  }
  func.func @transform_2(%arg0: i32, %arg1: i32) -> (i32, i32) {
    %c0_i32 = arith.constant 0 : i32
    %c0_i32_0 = arith.constant 0 : i32
    %c0_i32_1 = arith.constant 0 : i32
    return %c0_i32, %c0_i32_0 : i32, i32
  }
  func.func @transform_3(%arg0: i32, %arg1: i32) -> (i32, i32, i32) {
    %c0_i32 = arith.constant 0 : i32
    %c0_i32_0 = arith.constant 0 : i32
    %c0_i32_1 = arith.constant 0 : i32
    return %arg1, %c0_i32, %c0_i32_0 : i32, i32, i32
  }
  func.func @transform_4(%arg0: i32, %arg1: i32) -> (i32, i32, i32) {
    %c0_i32 = arith.constant 0 : i32
    %c0_i32_0 = arith.constant 0 : i32
    %c0_i32_1 = arith.constant 0 : i32
    return %arg1, %c0_i32, %c0_i32_0 : i32, i32, i32
  }
  func.func @transform_5(%arg0: i32, %arg1: i32) -> (i32, i32, i32) {
    %c0_i32 = arith.constant 0 : i32
    %c0_i32_0 = arith.constant 0 : i32
    %c0_i32_1 = arith.constant 0 : i32
    return %arg1, %c0_i32, %c0_i32_0 : i32, i32, i32
  }
  func.func @transform_6(%arg0: i32, %arg1: i32) -> (i32, i32, i32) {
    %c0_i32 = arith.constant 0 : i32
    %c0_i32_0 = arith.constant 0 : i32
    %c0_i32_1 = arith.constant 0 : i32
    return %arg1, %c0_i32, %c0_i32_0 : i32, i32, i32
  }
  func.func @transform_7(%arg0: i32, %arg1: i32) -> (i32, i32) {
    %c0_i32 = arith.constant 0 : i32
    %c0_i32_0 = arith.constant 0 : i32
    return %arg0, %c0_i32 : i32, i32
  }
  func.func @transform_8(%arg0: i32, %arg1: i32) -> (i32, i32) {
    %c0_i32 = arith.constant 0 : i32
    %c0_i32_0 = arith.constant 0 : i32
    return %arg0, %c0_i32 : i32, i32
  }
}

</mosaic_0001>

<bundles_post_ra>
// kernel: tpu_custom_call.1
= control target key start
LH: loop header
LB: loop body
LE: loop exit
PB: predicated region body
PF: predicated region fallthrough
CT: control target
= control target key end

     0   :  { %14 = vsyncpa [#allocation5], 0  ;;  %s1354_s0 = inlined_call_operand.vmem [shape: f32[16,32], index: 0, kind: input, shape index: {}]   ;;  %s1355_s1 = inlined_call_operand.vmem [shape: f32[32,128], index: 1, kind: input, shape index: {}]   ;;  %s1356_s2 = inlined_call_operand.vmem [shape: f32[1,128], index: 2, kind: input, shape index: {}]   ;;  %s1357_s3 = inlined_call_operand.vmem [shape: f32[4,32,64], index: 3, kind: input, shape index: {}]   ;;  %s1358_s4 = inlined_call_operand.vmem [shape: f32[4,1,64], index: 4, kind: input, shape index: {}]   ;;  %s1359_s5 = inlined_call_operand.vmem [shape: f32[4,64,32], index: 5, kind: input, shape index: {}]   ;;  %s1360_s6 = inlined_call_operand.vmem [shape: f32[4,1,32], index: 6, kind: input, shape index: {}]   ;;  %s1361_s7 = inlined_call_operand.hbm [shape: f32[16,32], index: 7, kind: output, shape index: {0}]   ;;  %s1362_s8 = inlined_call_operand.hbm [shape: f32[16,128], index: 8, kind: output, shape index: {1}]  }
   0x1   :  { %15 = vsyncpa [#allocation7], 0  ;;  %s1192_s27 = smov 0   ;;  %s1194_s28 = smov 0  }
   0x2   :  { %s1196_s29 = smov 0  }
   0x3 LB: > { %s882_s30 = sadd.s32 4294967295, %s1140_s29   ;;  %s30_s9 = sadd.s32 1, %s1136_s28  ;;  %s1140_s29 = sphi %s1196_s29, %s21_s29   ;;  %s1136_s28 = sphi %s1194_s28, %s1365_s28   ;;  %s1132_s27 = sphi %s1192_s27, %s1364_s27  }
   0x4   : > { %p31_p0 = scmp.ge.s32.totalorder %s30_s9, 4  ;;  %p886_p1 = scmp.ge.s32.totalorder %s1140_s29, 1 }
   0x5   : > { %p316_p2 = scmp.lt.s32.totalorder %s1140_s29, 5 }
   0x6   : > { %s1367_s9 = smov (%p31_p0, %s30_s9), 0 }
   0x7   : > { %p317_p3 = pnand %p886_p1, %p316_p2 }
   0x8   : > { %p367_p4 = scmp.lt.s32.totalorder (!%p317_p3), %s1132_s27, 3  ;;  %p891_p5 = scmp.ne.s32.totalorder (!%p317_p3), %s1132_s27, 0 }
   0x9   : > { %320 = sbr.rel (%p317_p3) target bundleno = 1093 (0x445), region = 48 }
  0x10   : > { %s1215_s10 = scalar_select %p367_p4, %s1132_s27, 3 }
  0x11   : > { %388 = sbr.rel (%p891_p5) target bundleno = 560 (0x230), region = 52  ;;  %v391_v0 = vld [vmem:[%s1355_s1] sm:$0xff] (!%p891_p5)  ;;  %v392_v1 = vld [vmem:[%s1355_s1 + $0x8] sm:$0xff] (!%p891_p5)  ;;  %v393_v2 = vld [vmem:[%s1355_s1 + $0x10] sm:$0xff] (!%p891_p5)  ;;  %vm402_vm0 = vcmask (!%p891_p5), 261120   ;;  %v1142_v6 = vmov (!%p891_p5), 0.0  }
  0x12   : > { %s908_s11 = sshll.u32 %s1215_s10, 5  ;;  %s374_s14 = scalar_lea.vmem %s1358_s4, %s1215_s10  ;;  %v973_v3 = vpack.c.bf16 (!%p891_p5), %v392_v1, %v391_v0  ;;  %v394_v4 = vld [vmem:[%s1355_s1 + $0x18] sm:$0xff] (!%p891_p5)  ;;  %v389_v5 = vld [vmem:[%s1354_s0] sm:$0xff] (!%p891_p5)  ;;  %506 = vst.msk [vmem:[#allocation2] sm:$0xff] (!%p891_p5), %vm402_vm0, %v1142_v6  ;;  %507 = vst.msk [vmem:[#allocation2 + $0x8] sm:$0xff] (!%p891_p5), %vm402_vm0, %v1142_v6 }
  0x13   : > { %s1225_s17 = scalar_lea.vmem %s1357_s3, %s908_s11  ;;  %s909_s18 = sshll.u32 %s1215_s10, 6  ;;  %v977_v7 = vpack.c.bf16 (!%p891_p5), %v394_v4, %v393_v2  ;;  %940 = vmatprep.mubr.msk.f32.mxu0 (!%p891_p5), %vm402_vm0, %v389_v5  ;;  %v390_v8 = vld [vmem:[%s1354_s0 + $0x8] sm:$0xff] (!%p891_p5)  ;;  %v892_v9 = vld [vmem:[%s1356_s2] ss:$0 sm:$0xff] (!%p891_p5) }
  0x14   : > { %s1231_s21 = scalar_lea.vmem %s1359_s5, %s909_s18  ;;  %s382_s24 = scalar_lea.vmem %s1360_s6, %s1215_s10  ;;  %974 = vmatprep.subr.bf16.mxu0 (!%p891_p5), %v973_v3 }
  0x15   : > { %976 = vmatpush3.bf16.msra.mxu0 (!%p891_p5), %v973_v3 }
  0x16   : > { %978 = vmatprep.subr.bf16.mxu0 (!%p891_p5), %v977_v7 }
  0x19   : > { %980 = vmatpush3.bf16.msra.mxu0 %v977_v7 }
  0x1c   : > { %941 = vmatmul.mubr.msk.f32.vlgmr.msra.gmra.mrb[0].mxu0 %vm402_vm0, %v390_v8 }
  0xef   : > { %v942_v10 = vpop.f32.mrb[0].mxu0 }
  0xf0   : > { %v475_v11 = vpop.f32.mrb[1].mxu0  ;;  %v481_v13 = vadd.f32 %v942_v10, %v892_v9 }
  0xf1   : > { %v476_v12 = vadd.f32 %v892_v9, %v475_v11 }
  0xf3   : > { %484 = vmax.xlane.f32.xlu0 %v476_v12 }
  0xf7   : > { %486 = vmax.xlane.f32.xlu0 %v481_v13 }
 0x180   : > { %v485_v14 = vpop.xlane.xlu0 %484 }
 0x181   : > { %v488_v15 = vsub.f32 %v476_v12, %v485_v14 }
 0x183   : > { %v490_v16 = vmul.f32 1.442695, %v488_v15 }
 0x184   : > { %v487_v17 = vpop.xlane.xlu0 %486 }
 0x185   : > { %1046 = vpow2.f32 %v490_v16  ;;  %v489_v18 = vsub.f32 %v481_v13, %v487_v17 }
 0x187   : > { %v492_v19 = vmul.f32 1.442695, %v489_v18 }
 0x189   : > { %1048 = vpow2.f32 %v492_v19 }
 0x18f   : > { %v1047_v20 = vpop.eup %1046 }
 0x190   : > { %494 = vadd.xlane.f32.xlu1 %v1047_v20 }
 0x193   : > { %v1049_v21 = vpop.eup %1048 }
 0x194   : > { %496 = vadd.xlane.f32.xlu1 %v1049_v21 }
 0x21d   : > { %v495_v22 = vpop.xlane.xlu1 %494 }
 0x21e   : > { %1050 = vrcp.f32 %v495_v22 }
 0x221   : > { %v497_v23 = vpop.xlane.xlu1 %496 }
 0x222   : > { %1052 = vrcp.f32 %v497_v23 }
 0x228   : > { %v1051_v24 = vpop.eup %1050 }
 0x229   : > { %v500_v25 = vmul.f32 %v1051_v24, %v1047_v20 }
 0x22b   : > { %502 = vst [vmem:[#allocation3] sm:$0xff] %v500_v25  ;;  %504 = vst [vmem:[#allocation6] sm:$0xff] %v500_v25 }
 0x22c   : > { %v1053_v26 = vpop.eup %1052 }
 0x22d   : > { %v501_v27 = vmul.f32 %v1053_v26, %v1049_v21 }
 0x22f   : > { %503 = vst [vmem:[#allocation3 + $0x8] sm:$0xff] %v501_v27  ;;  %505 = vst [vmem:[#allocation6 + $0x8] sm:$0xff] %v501_v27 }
 0x230 PF: > { %v510_v28 = vld [vmem:[%s1225_s17] sm:$0xff]  ;;  %v511_v29 = vld [vmem:[%s1225_s17 + $0x8] sm:$0xff]  ;;  %v512_v30 = vld [vmem:[%s1225_s17 + $0x10] sm:$0xff]  ;;  %vm521_vm1 = vcmask 261120   ;;  %v718_v48 = vlaneseq  ;;  %v720_v49 = vstv %s1132_s27  ;;  %vm636_vm3 = vcmask 523264   ;;  %p901_p6 = scmp.ne.s32.totalorder %s1132_s27, 3 }
 0x231   : > { %v981_v31 = vpack.c.bf16 %v511_v29, %v510_v28  ;;  %v513_v32 = vld [vmem:[%s1225_s17 + $0x18] sm:$0xff]  ;;  %v508_v33 = vld [vmem:[%s1354_s0] sm:$0xff]  ;;  %v509_v35 = vld [vmem:[%s1354_s0 + $0x8] sm:$0xff] }
 0x232   : > { %v985_v34 = vpack.c.bf16 %v513_v32, %v512_v30  ;;  %951 = vmatprep.mubr.msk.f32.mxu0 %vm521_vm1, %v508_v33  ;;  %v621_v36 = vld [vmem:[%s1231_s21] sm:$0xff]  ;;  %v622_v37 = vld [vmem:[%s1231_s21 + $0x8] sm:$0xff]  ;;  %v623_v38 = vld [vmem:[%s1231_s21 + $0x10] sm:$0xff]  ;;  %v719_v50 = vand.u32 127, %v718_v48 }
 0x233   : > { %982 = vmatprep.subr.bf16.mxu0 %v981_v31  ;;  %v989_v39 = vpack.c.bf16 %v622_v37, %v621_v36  ;;  %v624_v40 = vld [vmem:[%s1231_s21 + $0x18] sm:$0xff]  ;;  %v625_v42 = vld [vmem:[%s1231_s21 + $0x20] sm:$0xff]  ;;  %v626_v43 = vld [vmem:[%s1231_s21 + $0x28] sm:$0xff] }
 0x234   : > { %984 = vmatpush3.bf16.msra.mxu0 %v981_v31  ;;  %v993_v41 = vpack.c.bf16 %v624_v40, %v623_v38  ;;  %v997_v44 = vpack.c.bf16 %v626_v43, %v625_v42  ;;  %v627_v45 = vld [vmem:[%s1231_s21 + $0x30] sm:$0xff]  ;;  %v628_v46 = vld [vmem:[%s1231_s21 + $0x38] sm:$0xff]  ;;  %vm721_vm2 = vcmp.eq.s32.totalorder %v719_v50, %v720_v49  ;;  %v895_v55 = vld [vmem:[%s374_s14] ss:$0 sm:$0xff] }
 0x235   : > { %986 = vmatprep.subr.bf16.mxu0 %v985_v34  ;;  %990 = vmatprep.subr.bf16.mxu1 %v989_v39  ;;  %v1001_v47 = vpack.c.bf16 %v628_v46, %v627_v45  ;;  %v722_v51 = vld [vmem:[#allocation3] sm:$0xff]  ;;  %v898_v15 = vld [vmem:[%s382_s24] ss:$0 sm:$0xff]  ;;  %v731_v21 = vld [vmem:[#allocation2 + $0x8] sm:$0xff] }
 0x236   : > { %992 = vmatpush3.bf16.msra.mxu1 %v989_v39  ;;  %v723_v52 = vld [vmem:[#allocation3 + $0x8] sm:$0xff]  ;;  %v724_v53 = vsel %vm721_vm2, %v722_v51, 0.0  ;;  %v730_v22 = vld [vmem:[#allocation2] sm:$0xff] }
 0x237   : > { %994 = vmatprep.subr.bf16.mxu1 %v993_v41  ;;  %726 = vadd.xlane.f32.xlu0 %v724_v53  ;;  %v725_v54 = vsel %vm721_vm2, %v723_v52, 0.0 }
 0x238   : > { %988 = vmatpush3.bf16.msra.mxu0 %v985_v34 }
 0x23a   : > { %996 = vmatpush3.bf16.msra.mxu1 %v993_v41 }
 0x23b   : > { %952 = vmatmul.mubr.msk.f32.vlgmr.msra.gmra.mrb[0].mxu0 %vm521_vm1, %v509_v35  ;;  %998 = vmatprep.subr.bf16.mxu1 %v997_v44 }
 0x23c   : > { %728 = vadd.xlane.f32.xlu0 %v725_v54 }
 0x23e   : > { %1000 = vmatpush3.bf16.msra.mxu1 %v997_v44 }
 0x23f   : > { %1002 = vmatprep.subr.bf16.mxu1 %v1001_v47 }
 0x242   : > { %1004 = vmatpush3.bf16.msra.mxu1 %v1001_v47 }
 0x2c4   : > { %v727_v14 = vpop.xlane.xlu0 %726 }
 0x2c9   : > { %v729_v17 = vpop.xlane.xlu0 %728 }
 0x30e   : > { %v953_v56 = vpop.f32.mrb[0].mxu0 }
 0x30f   : > { %v600_v57 = vadd.f32 %v953_v56, %v895_v55  ;;  %v594_v58 = vpop.f32.mrb[1].mxu0 }
 0x310   : > { %v595_v59 = vadd.f32 %v895_v55, %v594_v58 }
 0x311   : > { %v604_v60 = vmul.f32 %v600_v57, %v600_v57 }
 0x312   : > { %v603_v61 = vmul.f32 %v595_v59, %v595_v59 }
 0x313   : > { %v606_v62 = vmul.f32 %v604_v60, %v600_v57 }
 0x314   : > { %v605_v63 = vmul.f32 %v603_v61, %v595_v59 }
 0x315   : > { %v608_v0 = vmul.f32 0.044715, %v606_v62 }
 0x316   : > { %v607_v1 = vmul.f32 0.044715, %v605_v63 }
 0x317   : > { %v610_v2 = vadd.f32 %v608_v0, %v600_v57 }
 0x318   : > { %v609_v3 = vadd.f32 %v607_v1, %v595_v59 }
 0x319   : > { %v612_v4 = vmul.f32 0.7978846, %v610_v2 }
 0x31a   : > { %v611_v5 = vmul.f32 0.7978846, %v609_v3 }
 0x31b   : > { %1054 = vtanh.f32 %v612_v4 }
 0x31c   : > { %1056 = vtanh.f32 %v611_v5 }
 0x325   : > { %v1055_v6 = vpop.eup %1054 }
 0x326   : > { %v1057_v7 = vpop.eup %1056  ;;  %v616_v8 = vadd.f32 1.0, %v1055_v6 }
 0x327   : > { %v615_v9 = vadd.f32 1.0, %v1057_v7 }
 0x328   : > { %v618_v10 = vmul.f32 0.5, %v616_v8 }
 0x329   : > { %v617_v11 = vmul.f32 0.5, %v615_v9 }
 0x32a   : > { %v620_v13 = vmul.f32 %v618_v10, %v600_v57 }
 0x32b   : > { %v619_v12 = vmul.f32 %v617_v11, %v595_v59 }
 0x32d   : > { %970 = vmatprep.mubr.msk.f32.mxu1 %vm636_vm3, %v619_v12 }
 0x32e   : > { %971 = vmatmul.mubr.msk.f32.vlgmr.msra.gmra.mrb[0].mxu1 %vm636_vm3, %v620_v13 }
 0x401   : > { %v972_v16 = vpop.f32.mrb[0].mxu1 }
 0x402   : > { %v715_v18 = vadd.f32 %v972_v16, %v898_v15  ;;  %v709_v19 = vpop.f32.mrb[1].mxu1 }
 0x403   : > { %v710_v20 = vadd.f32 %v898_v15, %v709_v19  ;;  %741 = sbr.rel (%p901_p6) target bundleno = 1042 (0x412), region = 56 }
 0x404   : > { %v733_v23 = vmul.f32 %v729_v17, %v715_v18 }
 0x405   : > { %v732_v24 = vmul.f32 %v727_v14, %v710_v20 }
 0x406   : > { %v735_v25 = vadd.f32 %v733_v23, %v731_v21 }
 0x407   : > { %v734_v26 = vadd.f32 %v732_v24, %v730_v22 }
 0x408   : > { %737 = vst.msk [vmem:[#allocation2 + $0x8] sm:$0xff] %vm521_vm1, %v735_v25 }
 0x409   : > { %736 = vst.msk [vmem:[#allocation2] sm:$0xff] %vm521_vm1, %v734_v26 }
 0x40f   : > { %v743_v28 = vld [vmem:[#allocation2 + $0x8] sm:$0xff] }
 0x410   : > { %v742_v27 = vld [vmem:[#allocation2] sm:$0xff]  ;;  %745 = vst.msk [vmem:[#allocation4 + $0x8] sm:$0xff] %vm521_vm1, %v743_v28 }
 0x411   : > { %744 = vst.msk [vmem:[#allocation4] sm:$0xff] %vm521_vm1, %v742_v27 }
 0x412 PF: > { %p1297_p7 = scmp.eq.s32.totalorder %s882_s30, 3  ;;  %s1143_s24 = smov [#allocation4]  }
 0x413   : > { %s755_s18 = sshll.u32 %s1143_s24, 4  ;;  %s756_s18 = int_to_ptr.vmem [resolvable:$true] %s755_s18 }
 0x414   : > { %s1058_s19 = scalar_lea.vmem %s756_s18, 256  ;;  %p1065_p11 = scmp.lt.s32.totalorder %s756_s18, %s756_s18 }
 0x415   : > { %p1059_p8 = scmp.ne.s32.totalorder %s756_s18, %s1058_s19  ;;  %p1066_p12 = scmp.lt.s32.totalorder %s1058_s19, %s1058_s19 }
 0x417   : > { %p1060_p9 = pnand %p1059_p8, %p1297_p7  ;;  %p1067_p13 = por %p1066_p12, %p1065_p11 }
 0x419   : > { %p1061_p10 = pneg %p1060_p9 }
 0x41b   : > { %p1068_p0 = pnand %p1067_p13, %p1061_p10 }
 0x41d   : > { %1071 = shalt.err (!%p1068_p0)
}
 0x41e   : > { %s1072_s30 = scalar_lea.hbm %s1361_s7, 256 }
 0x41f   : > { %p1073_p1 = scmp.ne.s32.totalorder %s1361_s7, %s1072_s30  ;;  %p1078_p4 = scmp.lt.u32.totalorder %s1072_s30, %s1361_s7 }
 0x421   : > { %p1074_p2 = pnand %p1073_p1, %p1297_p7 }
 0x423   : > { %p1075_p3 = pneg %p1074_p2 }
 0x425   : > { %p1080_p5 = pnand %p1078_p4, %p1075_p3 }
 0x427   : > { %1083 = shalt.err (!%p1080_p5)
}
 0x428   : > { %s1144_s12 = smov 128   ;;  %s1145_s11 = smov 8  }
 0x429   : > { %1006 = dma.vmem_to_hbm [thread:$0]  (%p1297_p7), %s756_s18, 256, %s1361_s7, [#allocation5], %s1144_s12, %s1144_s12, %s1145_s11  }
 0x42a   : > { %s1146_s17 = smov [#allocation6]  }
 0x42b   : > { %s771_s16 = sshll.u32 %s1146_s17, 4  ;;  %s772_s16 = int_to_ptr.vmem [resolvable:$true] %s771_s16 }
 0x42c   : > { %s1084_s14 = scalar_lea.vmem %s772_s16, 256  ;;  %p1091_p10 = scmp.lt.s32.totalorder %s772_s16, %s772_s16 }
 0x42d   : > { %p1085_p6 = scmp.ne.s32.totalorder %s772_s16, %s1084_s14  ;;  %p1092_p11 = scmp.lt.s32.totalorder %s1084_s14, %s1084_s14 }
 0x42f   : > { %p1086_p8 = pnand %p1085_p6, %p1297_p7  ;;  %p1093_p12 = por %p1092_p11, %p1091_p10 }
 0x431   : > { %p1087_p9 = pneg %p1086_p8 }
 0x433   : > { %p1094_p13 = pnand %p1093_p12, %p1087_p9 }
 0x435   : > { %1097 = shalt.err (!%p1094_p13)
}
 0x436   : > { %s1098_s19 = scalar_lea.hbm %s1362_s8, 256 }
 0x437   : > { %p1099_p0 = scmp.ne.s32.totalorder %s1362_s8, %s1098_s19  ;;  %p1104_p3 = scmp.lt.u32.totalorder %s1098_s19, %s1362_s8 }
 0x439   : > { %p1100_p1 = pnand %p1099_p0, %p1297_p7 }
 0x43b   : > { %p1101_p2 = pneg %p1100_p1 }
 0x43d   : > { %p1106_p4 = pnand %p1104_p3, %p1101_p2 }
 0x43f   : > { %1109 = shalt.err (!%p1106_p4)
}
 0x440   : > { %1008 = dma.vmem_to_hbm [thread:$0]  (%p1297_p7), %s772_s16, 256, %s1362_s8, [#allocation7], %s1144_s12, %s1144_s12, %s1145_s11  }
 0x441   : > { %1123 = dma.done.wait (%p1297_p7), [#allocation5], 256  }
 0x442   : > { %1125 = vsyncadd (%p1297_p7), [#allocation5], 4294967040 }
 0x443   : > { %1127 = dma.done.wait (%p1297_p7), [#allocation7], 256  }
 0x444   : > { %1129 = vsyncadd (%p1297_p7), [#allocation7], 4294967040 }
 0x445 PF: > { %s21_s29 = sadd.s32 1, %s1140_s29   ;;  %s1364_s27 = smov %s1136_s28 }
 0x446   : > { %p18_p5 = scmp.ge.s32.totalorder %s21_s29, 6   ;;  %s1365_s28 = smov %s1367_s9 }
 0x448   :  { %20 = sbr.rel (!%p18_p5) target bundleno = 3 (0x3), region = 105 }
 0x44f   :  { %791 = vsyncpa [#allocation5], 1 }
 0x450   :  { %793 = vsyncpa [#allocation5 + $0x1], 1 }
 0x451   :  { %794 = vsyncpa [#allocation7], 1 }

</bundles_post_ra>
